<compile_context>
chip_gen: v7x
topology: tpu7x:2x2x1
jax: 0.10.0
libtpu: 0.0.40
codegen_flags: <defaults>
</compile_context>

<pallas_src>
import jax
import jax.numpy as jnp
from jax.experimental import pallas as pl
from jax.experimental.pallas import tpu as pltpu


def _mv_linear_kernel(x_ref, w_ref, b_ref, o_ref):
    # x_ref: (tile_bs, Cin*M)  w_ref: (Cin*M, Npad)  b_ref: (1, Npad)
    acc = jnp.dot(x_ref[...], w_ref[...], preferred_element_type=jnp.float32)
    o_ref[...] = (acc + b_ref[...]).astype(o_ref.dtype)


def nonequi_mv_linear(x, w, bias, *, tile_bs=4096):
    """x: (B, S, Cin, M); w: (Cout, Cin, M); bias: (Cout, M)."""
    B, S, Cin, M = x.shape
    Cout = w.shape[0]
    BS = B * S
    CinM = Cin * M        # contraction width (lane-dense K), full minor dim
    CoutM = Cout * M      # logical output lane width
    # Pad output lanes up to a multiple of 128 -> unmasked 128-wide vst.
    Npad = max(128, ((CoutM + 127) // 128) * 128)

    # Lane-dense flat input: contiguous reshape, zero extra HBM passes.
    x2 = x.reshape(BS, CinM)

    # Block-diagonal weight: Wbd[c*M+m, C*M+n] = w[C,c,m] * (m == n).
    # Tiny (64 x 128 here); built once in the wrapper.
    eye = jnp.eye(M, dtype=x.dtype)
    w_bd = jnp.einsum('Ccm,mn->cmCn', w.astype(x.dtype), eye).reshape(CinM, CoutM)
    b2 = bias.astype(x.dtype).reshape(1, CoutM)
    if Npad != CoutM:
        w_bd = jnp.pad(w_bd, ((0, 0), (0, Npad - CoutM)))
        b2 = jnp.pad(b2, ((0, 0), (0, Npad - CoutM)))

    # Row tile: multiple of 8 sublanes, clamped to the problem size.
    tile_bs = max(8, ((min(tile_bs, BS) + 7) // 8) * 8)
    grid = (pl.cdiv(BS, tile_bs),)

    out = pl.pallas_call(
        _mv_linear_kernel,
        out_shape=jax.ShapeDtypeStruct((BS, Npad), x.dtype),
        grid=grid,
        in_specs=[
            # x: one row-slab per grid step (auto double-buffered by Pallas).
            pl.BlockSpec((tile_bs, CinM), lambda i: (i, 0)),
            # weight / bias: constant block index -> loaded once, resident in
            # VMEM across the whole grid.
            pl.BlockSpec((CinM, Npad), lambda i: (0, 0)),
            pl.BlockSpec((1, Npad), lambda i: (0, 0)),
        ],
        out_specs=pl.BlockSpec((tile_bs, Npad), lambda i: (i, 0)),
        compiler_params=pltpu.CompilerParams(
            dimension_semantics=("parallel",)),
    )(x2, w_bd, b2)                                            # (BS, Npad)

    if Npad != CoutM:
        out = out[:, :CoutM]
    return out.reshape(B, S, Cout, M)                          # free reshape


if __name__ == "__main__":
    # Small, deterministic shapes consistent with the module's forward.
    B, S = 2, 8
    in_channels, out_channels = 4, 8
    MV_dim = 16

    key = jax.random.PRNGKey(0)
    kx, kw, kb = jax.random.split(key, 3)
    x = jax.random.normal(kx, (B, S, in_channels, MV_dim), dtype=jnp.float32)
    w = jax.random.normal(kw, (out_channels, in_channels, MV_dim), dtype=jnp.float32)
    bias = jax.random.normal(kb, (out_channels, MV_dim), dtype=jnp.float32)

    out = nonequi_mv_linear(x, w, bias)
    out = jax.block_until_ready(out)

    # Pure-JAX reference for correctness.
    ref = jnp.einsum('bscm,Ccm->bsCm', x, w) + bias
    assert out.shape == (B, S, out_channels, MV_dim)
    assert jnp.allclose(out, ref, atol=1e-4, rtol=1e-4), "mismatch vs reference"

    print("KERNEL_OK")
</pallas_src>

<mosaic_0001>
module attributes {stable_mosaic.version = 11 : i64} {
  func.func @_mv_linear_kernel(%arg0: i32, %arg1: memref<16x64xf32, #tpu.memory_space<vmem>>, %arg2: memref<64x128xf32, #tpu.memory_space<vmem>>, %arg3: memref<1x128xf32, #tpu.memory_space<vmem>>, %arg4: memref<16x128xf32, #tpu.memory_space<vmem>>) attributes {dimension_semantics = [#tpu.dimension_semantics<parallel>], iteration_bounds = array<i64: 1>, scalar_prefetch = 0 : i64, scratch_operands = 0 : i64, tpu.core_type = #tpu.core_type<tc>, window_params = [{transform_indices = @transform_0, window_bounds = array<i64: 16, 64>}, {pipeline_mode = #tpu.pipeline_mode<synchronous>, transform_indices = @transform_1, window_bounds = array<i64: 64, 128>}, {pipeline_mode = #tpu.pipeline_mode<synchronous>, transform_indices = @transform_2, window_bounds = array<i64: 1, 128>}, {transform_indices = @transform_3, window_bounds = array<i64: 16, 128>}]} {
    %c0 = arith.constant 0 : index
    %c0_0 = arith.constant 0 : index
    %0 = vector.load %arg1[%c0, %c0_0] : memref<16x64xf32, #tpu.memory_space<vmem>>, vector<16x64xf32>
    %c0_1 = arith.constant 0 : index
    %c0_2 = arith.constant 0 : index
    %1 = vector.load %arg2[%c0_1, %c0_2] : memref<64x128xf32, #tpu.memory_space<vmem>>, vector<64x128xf32>
    %cst = arith.constant dense<0.000000e+00> : vector<16x128xf32>
    %2 = tpu.matmul %0, %1, %cst {dimension_numbers = #tpu.dot_dimension_numbers<[1], [0], [0], [1], [0, 0, 1, 1], [], []>} : vector<16x64xf32>, vector<64x128xf32>, vector<16x128xf32> -> vector<16x128xf32>
    %c0_3 = arith.constant 0 : index
    %c0_4 = arith.constant 0 : index
    %3 = vector.load %arg3[%c0_3, %c0_4] : memref<1x128xf32, #tpu.memory_space<vmem>>, vector<1x128xf32>
    %4 = vector.broadcast %3 : vector<1x128xf32> to vector<16x128xf32>
    %5 = arith.addf %2, %4 : vector<16x128xf32>
    %c0_5 = arith.constant 0 : index
    %c0_6 = arith.constant 0 : index
    %6 = vector.load %arg4[%c0_5, %c0_6] : memref<16x128xf32, #tpu.memory_space<vmem>>, vector<16x128xf32>
    tpu.vector_store %arg4[%c0_5, %c0_6], %5 {strides = array<i32>} : memref<16x128xf32, #tpu.memory_space<vmem>>, vector<16x128xf32>,
    return
  }
  func.func @transform_0(%arg0: i32) -> (i32, i32) {
    %c0_i32 = arith.constant 0 : i32
    %c0_i32_0 = arith.constant 0 : i32
    return %arg0, %c0_i32 : i32, i32
  }
  func.func @transform_1(%arg0: i32) -> (i32, i32) {
    %c0_i32 = arith.constant 0 : i32
    %c0_i32_0 = arith.constant 0 : i32
    %c0_i32_1 = arith.constant 0 : i32
    return %c0_i32, %c0_i32_0 : i32, i32
  }
  func.func @transform_2(%arg0: i32) -> (i32, i32) {
    %c0_i32 = arith.constant 0 : i32
    %c0_i32_0 = arith.constant 0 : i32
    %c0_i32_1 = arith.constant 0 : i32
    return %c0_i32, %c0_i32_0 : i32, i32
  }
  func.func @transform_3(%arg0: i32) -> (i32, i32) {
    %c0_i32 = arith.constant 0 : i32
    %c0_i32_0 = arith.constant 0 : i32
    return %arg0, %c0_i32 : i32, i32
  }
}

</mosaic_0001>

<bundles_post_ra>
// kernel: tpu_custom_call.1
= control target key start
LH: loop header
LB: loop body
LE: loop exit
PB: predicated region body
PF: predicated region fallthrough
CT: control target
= control target key end

     0   :  { %8 = vsyncpa [#allocation3], 0  ;;  %s362_s0 = inlined_call_operand.hbm [shape: f32[16,64], index: 0, kind: input, shape index: {}]   ;;  %s363_s1 = inlined_call_operand.hbm [shape: f32[64,128], index: 1, kind: input, shape index: {}]   ;;  %s364_s2 = inlined_call_operand.vmem [shape: f32[1,128], index: 2, kind: input, shape index: {}]   ;;  %s365_s3 = inlined_call_operand.hbm [shape: f32[16,128], index: 3, kind: output, shape index: {}]  }
   0x1   :  { %9 = vsyncpa [#allocation6], 0 }
   0x2   :  { %10 = vsyncpa [#allocation4], 0  ;;  %s287_s12 = smov [#allocation2]   ;;  %s215_s16 = scalar_lea.hbm %s362_s0, 256 }
   0x3   :  { %s16_s13 = sshll.u32 %s287_s12, 4  ;;  %p216_p0 = scmp.ne.s32.totalorder %s362_s0, %s215_s16  ;;  %s17_s13 = int_to_ptr.vmem [resolvable:$true] %s16_s13 }
   0x4   :  { %p219_p1 = scmp.lt.u32.totalorder %s215_s16, %s362_s0 }
   0x6   :  { %p221_p2 = pnand %p219_p1, %p216_p0 }
   0x8   :  { %224 = shalt.err (!%p221_p2)
}
   0x9   :  { %s225_s21 = scalar_lea.vmem %s17_s13, 256  ;;  %p230_p4 = scmp.lt.s32.totalorder %s17_s13, %s17_s13 }
   0xa   :  { %p226_p3 = scmp.ne.s32.totalorder %s17_s13, %s225_s21  ;;  %p231_p5 = scmp.lt.s32.totalorder %s225_s21, %s225_s21 }
   0xc   :  { %p232_p6 = por %p231_p5, %p230_p4 }
   0xe   :  { %p233_p7 = pnand %p232_p6, %p226_p3 }
  0x10   :  { %236 = shalt.err (!%p233_p7)
}
  0x11   :  { %s288_s22 = smov 128   ;;  %s289_s23 = smov 8  }
  0x12   :  { %22 = dma.hbm_to_vmem [thread:$0]  %s362_s0, 256, %s17_s13, [#allocation3], %s288_s22, %s288_s22, %s289_s23  }
  0x13   :  { %s290_s26 = smov [#allocation5]   ;;  %s237_s30 = scalar_lea.hbm %s363_s1, 1024 }
  0x14   :  { %s28_s27 = sshll.u32 %s290_s26, 4  ;;  %p238_p8 = scmp.ne.s32.totalorder %s363_s1, %s237_s30  ;;  %s29_s27 = int_to_ptr.vmem [resolvable:$true] %s28_s27 }
  0x15   :  { %p241_p9 = scmp.lt.u32.totalorder %s237_s30, %s363_s1 }
  0x17   :  { %p243_p10 = pnand %p241_p9, %p238_p8 }
  0x19   :  { %246 = shalt.err (!%p243_p10)
}
  0x1a   :  { %s247_s8 = scalar_lea.vmem %s29_s27, 1024  ;;  %p252_p12 = scmp.lt.s32.totalorder %s29_s27, %s29_s27 }
  0x1b   :  { %p248_p11 = scmp.ne.s32.totalorder %s29_s27, %s247_s8  ;;  %p253_p13 = scmp.lt.s32.totalorder %s247_s8, %s247_s8 }
  0x1d   :  { %p254_p0 = por %p253_p13, %p252_p12 }
  0x1f   :  { %p255_p1 = pnand %p254_p0, %p248_p11 }
  0x21   :  { %258 = shalt.err (!%p255_p1)
}
  0x22   :  { %34 = dma.hbm_to_vmem [thread:$0]  %s363_s1, 1024, %s29_s27, [#allocation6], %s288_s22, %s288_s22, %s289_s23  }
  0x23   :  { %281 = dma.done.wait [#allocation3], 256  }
  0x24   :  { %282 = vsyncadd [#allocation3], 4294967040 }
  0x25   :  { %283 = dma.done.wait [#allocation6], 1024  }
  0x26   :  { %284 = vsyncadd [#allocation6], 4294966272  ;;  %v45_v0 = vld [vmem:[#allocation5] sm:$0xff]  ;;  %v46_v1 = vld [vmem:[#allocation5 + $0x8] sm:$0xff]  ;;  %vm60_vm0 = vcmask 523264   ;;  %s291_s11 = smov [#allocation7]  }
  0x27   :  { %v47_v2 = vld [vmem:[#allocation5 + $0x10] sm:$0xff]  ;;  %v194_v3 = vpack.c.bf16 %v46_v1, %v45_v0  ;;  %v48_v4 = vld [vmem:[#allocation5 + $0x18] sm:$0xff]  ;;  %v49_v6 = vld [vmem:[#allocation5 + $0x20] sm:$0xff]  ;;  %s149_s12 = sshll.u32 %s291_s11, 4  ;;  %s150_s12 = int_to_ptr.vmem [resolvable:$true] %s149_s12 }
  0x28   :  { %v198_v5 = vpack.c.bf16 %v48_v4, %v47_v2  ;;  %v50_v7 = vld [vmem:[#allocation5 + $0x28] sm:$0xff]  ;;  %v43_v8 = vld [vmem:[#allocation2] sm:$0xff]  ;;  %v52_v11 = vld [vmem:[#allocation5 + $0x38] sm:$0xff]  ;;  %s259_s13 = scalar_lea.vmem %s150_s12, 256  ;;  %p264_p3 = scmp.lt.s32.totalorder %s150_s12, %s150_s12 }
  0x29   :  { %195 = vmatprep.subr.bf16.mxu0 %v194_v3  ;;  %191 = vmatprep.mubr.msk.f32.mxu0 %vm60_vm0, %v43_v8  ;;  %v202_v9 = vpack.c.bf16 %v50_v7, %v49_v6  ;;  %v51_v10 = vld [vmem:[#allocation5 + $0x30] sm:$0xff]  ;;  %v44_v13 = vld [vmem:[#allocation2 + $0x8] sm:$0xff]  ;;  %p260_p2 = scmp.ne.s32.totalorder %s150_s12, %s259_s13  ;;  %p265_p4 = scmp.lt.s32.totalorder %s259_s13, %s259_s13 }
  0x2a   :  { %197 = vmatpush3.bf16.msra.mxu0 %v194_v3  ;;  %v206_v12 = vpack.c.bf16 %v52_v11, %v51_v10  ;;  %v162_v14 = vld [vmem:[%s364_s2] ss:$0 sm:$0xff] }
  0x2b   :  { %199 = vmatprep.subr.bf16.mxu0 %v198_v5  ;;  %p266_p5 = por %p265_p4, %p264_p3 }
  0x2d   :  { %p267_p6 = pnand %p266_p5, %p260_p2 }
  0x2e   :  { %201 = vmatpush3.bf16.msra.mxu0 %v198_v5 }
  0x2f   :  { %203 = vmatprep.subr.bf16.mxu0 %v202_v9 }
  0x32   :  { %205 = vmatpush3.bf16.msra.mxu0 %v202_v9 }
  0x33   :  { %207 = vmatprep.subr.bf16.mxu0 %v206_v12 }
  0x36   :  { %209 = vmatpush3.bf16.msra.mxu0 %v206_v12 }
  0x39   :  { %192 = vmatmul.mubr.msk.f32.vlgmr.msra.gmra.mrb[0].mxu0 %vm60_vm0, %v44_v13 }
 0x10c   :  { %v193_v15 = vpop.f32.mrb[0].mxu0 }
 0x10d   :  { %v139_v16 = vadd.f32 %v193_v15, %v162_v14  ;;  %v133_v17 = vpop.f32.mrb[1].mxu0 }
 0x10e   :  { %v134_v18 = vadd.f32 %v162_v14, %v133_v17 }
 0x10f   :  { %143 = vst [vmem:[#allocation7 + $0x8] sm:$0xff] %v139_v16 }
 0x110   :  { %142 = vst [vmem:[#allocation7] sm:$0xff] %v134_v18 }
 0x111   :  { %270 = shalt.err (!%p267_p6)
}
 0x112   :  { %s271_s2 = scalar_lea.hbm %s365_s3, 256 }
 0x113   :  { %p272_p7 = scmp.ne.s32.totalorder %s365_s3, %s271_s2  ;;  %p275_p8 = scmp.lt.u32.totalorder %s271_s2, %s365_s3 }
 0x115   :  { %p277_p9 = pnand %p275_p8, %p272_p7 }
 0x117   :  { %280 = shalt.err (!%p277_p9)
}
 0x118   :  { %155 = dma.vmem_to_hbm [thread:$0]  %s150_s12, 256, %s365_s3, [#allocation4], %s288_s22, %s288_s22, %s289_s23  }
 0x119   :  { %285 = dma.done.wait [#allocation4], 256  }
 0x11a   :  { %286 = vsyncadd [#allocation4], 4294967040 }
 0x11b   :  { %159 = vsyncpa [#allocation3], 1 }
 0x11c   :  { %160 = vsyncpa [#allocation6], 1 }
 0x11d   :  { %161 = vsyncpa [#allocation4], 1 }

</bundles_post_ra>
